<compile_context>
chip_gen: v7x
topology: tpu7x:2x2x1
jax: 0.10.0
libtpu: 0.0.40
codegen_flags: <defaults>
</compile_context>

<pallas_src>
import jax
import jax.numpy as jnp
from jax.experimental import pallas as pl
from jax.experimental.pallas import tpu as pltpu


# ----------------------------- kernels ------------------------------------ #

def _gcn_pass1_kernel(a_ref, xw1_ref, b1_ref, w2_ref, g1_ref, acc_ref):
    """Row-tile i, contraction-tile k:  acc += A[i,k] @ XW1[k];  epilogue -> G1[i]."""
    k = pl.program_id(1)

    @pl.when(k == 0)
    def _():
        acc_ref[...] = jnp.zeros_like(acc_ref)

    acc_ref[...] += jnp.dot(a_ref[...], xw1_ref[...],
                            preferred_element_type=jnp.float32)

    @pl.when(k == pl.num_programs(1) - 1)
    def _():
        # f32 epilogue (bias + ReLU), then the tiny per-tile H1 @ W2 matmul.
        h1 = jnp.maximum(acc_ref[...] + b1_ref[...], 0.0)
        g1_ref[...] = jnp.dot(h1, w2_ref[...],
                              preferred_element_type=jnp.float32
                              ).astype(g1_ref.dtype)


def _gcn_pass2_kernel(a_ref, g1_ref, b2_ref, wc_ref, bc_ref,
                      emb_ref, logp_ref, acc_ref):
    """Row-tile i, contraction-tile k:  acc += A[i,k] @ G1[k];  epilogue -> emb, logp."""
    k = pl.program_id(1)

    @pl.when(k == 0)
    def _():
        acc_ref[...] = jnp.zeros_like(acc_ref)

    acc_ref[...] += jnp.dot(a_ref[...], g1_ref[...],
                            preferred_element_type=jnp.float32)

    @pl.when(k == pl.num_programs(1) - 1)
    def _():
        h2 = jnp.maximum(acc_ref[...] + b2_ref[...], 0.0)        # f32
        emb_ref[...] = h2.astype(emb_ref.dtype)
        # classifier + log_softmax, all in f32 (lane-dense: Cp is a multiple of 128;
        # padded classes carry a -1e30 bias so exp() underflows to 0).
        logits = jnp.dot(h2, wc_ref[...],
                         preferred_element_type=jnp.float32) + bc_ref[...]
        m = jnp.max(logits, axis=1, keepdims=True)
        lse = m + jnp.log(jnp.sum(jnp.exp(logits - m), axis=1, keepdims=True))
        logp_ref[...] = (logits - lse).astype(logp_ref.dtype)


# ----------------------------- wrapper ------------------------------------ #

def _round_up(n, m):
    return ((n + m - 1) // m) * m


def _pad2(a, rows, cols):
    return jnp.zeros((rows, cols), a.dtype).at[:a.shape[0], :a.shape[1]].set(a)


def gnn_forward(x, edge_index, params):
    """x: [N, input_dim] float32, edge_index: [2, E] int32 (src, dst)."""
    w1, b1, w2, b2, wc_t, bc = params
    N, in_dim = x.shape
    H, B, C = w1.shape[1], w2.shape[1], wc_t.shape[1]

    # --- tile sizes / padded dims (lane-dense everywhere) ---
    tk = 512 if N >= 512 else (256 if N >= 256 else 128)   # A contraction tile
    tm = 256 if N >= 256 else 128                          # node-row tile
    Npad = _round_up(N, tk)                                # tk is a multiple of tm
    Hp, Bp, Cp = (_round_up(d, 128) for d in (H, B, C))

    # --- glue: PyG add_remaining_self_loops + gcn_norm, densified & padded ---
    # add_remaining_self_loops (edge_attr=None) drops existing self-loop edges and adds
    # exactly one unit-weight self-loop per node; duplicate non-self-loop edges accumulate.
    src, dst = edge_index[0], edge_index[1]
    not_loop = (src != dst).astype(jnp.float32)
    adj = jnp.zeros((Npad, Npad), jnp.float32).at[dst, src].add(not_loop)
    diag = jnp.arange(N)
    adj = adj.at[diag, diag].add(1.0)
    deg = jnp.sum(adj, axis=1)
    dinv = jnp.where(deg > 0, jax.lax.rsqrt(deg), 0.0)
    a_hat = (dinv[:, None] * adj * dinv[None, :]).astype(jnp.bfloat16)   # [Npad, Npad] bf16

    # --- hoist the tiny X @ W1 out of the A-tiled loop (stream result as bf16) ---
    x_pad = jnp.zeros((Npad, in_dim), jnp.float32).at[:N].set(x)
    w1_p = _pad2(w1, in_dim, Hp)
    xw1 = jnp.dot(x_pad, w1_p,
                  preferred_element_type=jnp.float32).astype(jnp.bfloat16)  # [Npad, Hp]

    b1_p = _pad2(b1.reshape(1, H), 1, Hp)
    w2_p = _pad2(w2, Hp, Bp)
    b2_p = _pad2(b2.reshape(1, B), 1, Bp)
    wc_p = _pad2(wc_t, Bp, Cp)
    bc_p = jnp.full((1, Cp), -1e30, jnp.float32).at[0, :C].set(bc)

    grid = (Npad // tm, Npad // tk)
    cparams = pltpu.CompilerParams(
        dimension_semantics=("parallel", "arbitrary"),   # row tiles across TCs on v7x
        vmem_limit_bytes=32 * 1024 * 1024,               # explicit; fits v5e/v6e/v7x
    )

    a_spec = pl.BlockSpec((tm, tk), lambda i, k: (i, k))
    def full(shape):
        return pl.BlockSpec(shape, lambda i, k: (0, 0))

    # --- pass 1: G1 = relu(A @ XW1 + b1) @ W2 ---
    g1 = pl.pallas_call(
        _gcn_pass1_kernel,
        grid=grid,
        in_specs=[a_spec,
                  pl.BlockSpec((tk, Hp), lambda i, k: (k, 0)),
                  full((1, Hp)),
                  full((Hp, Bp))],
        out_specs=pl.BlockSpec((tm, Bp), lambda i, k: (i, 0)),
        out_shape=jax.ShapeDtypeStruct((Npad, Bp), jnp.bfloat16),
        scratch_shapes=[pltpu.VMEM((tm, Hp), jnp.float32)],
        compiler_params=cparams,
        cost_estimate=pl.CostEstimate(
            flops=2 * Npad * Npad * Hp + 2 * Npad * Hp * Bp,
            transcendentals=0,
            bytes_accessed=2 * Npad * Npad + 2 * Npad * (Hp + Bp)),
    )(a_hat, xw1, b1_p, w2_p)

    # --- pass 2: H2 = relu(A @ G1 + b2); logits = H2 @ WcT + bc; log_softmax ---
    emb_p, logp_p = pl.pallas_call(
        _gcn_pass2_kernel,
        grid=grid,
        in_specs=[a_spec,
                  pl.BlockSpec((tk, Bp), lambda i, k: (k, 0)),
                  full((1, Bp)),
                  full((Bp, Cp)),
                  full((1, Cp))],
        out_specs=(pl.BlockSpec((tm, Bp), lambda i, k: (i, 0)),
                   pl.BlockSpec((tm, Cp), lambda i, k: (i, 0))),
        out_shape=(jax.ShapeDtypeStruct((Npad, Bp), jnp.float32),
                   jax.ShapeDtypeStruct((Npad, Cp), jnp.float32)),
        scratch_shapes=[pltpu.VMEM((tm, Bp), jnp.float32)],
        compiler_params=cparams,
        cost_estimate=pl.CostEstimate(
            flops=2 * Npad * Npad * Bp + 2 * Npad * Bp * Cp,
            transcendentals=Npad * Cp,
            bytes_accessed=2 * Npad * Npad + Npad * (2 * Bp + 4 * Bp + 4 * Cp)),
    )(a_hat, g1, b2_p, wc_p, bc_p)

    return emb_p[:N, :B], logp_p[:N, :C]


def init_params(key, input_dim, hidden_dim, bert_dim, num_classes):
    ks = jax.random.split(key, 6)

    def glorot(k, fan_in, fan_out):
        scale = jnp.sqrt(6.0 / (fan_in + fan_out))
        return jax.random.uniform(k, (fan_in, fan_out), jnp.float32, -scale, scale)

    w1 = glorot(ks[0], input_dim, hidden_dim)
    b1 = jnp.zeros((hidden_dim,), jnp.float32)
    w2 = glorot(ks[1], hidden_dim, bert_dim)
    b2 = jnp.zeros((bert_dim,), jnp.float32)
    # torch Linear weight is [num_classes, bert_dim]; pass transposed [bert_dim, num_classes]
    wc_t = glorot(ks[2], bert_dim, num_classes)
    bc = jax.random.uniform(ks[3], (num_classes,), jnp.float32, -0.1, 0.1)
    return (w1, b1, w2, b2, wc_t, bc)


# ----------------------------- demo / check -------------------------------- #

if __name__ == "__main__":
    key = jax.random.PRNGKey(0)
    k_x, k_e, k_p = jax.random.split(key, 3)

    N, input_dim, hidden_dim, bert_dim, num_classes = 16, 8, 16, 32, 4
    E = 40

    x = jax.random.normal(k_x, (N, input_dim), jnp.float32)
    edge_index = jax.random.randint(k_e, (2, E), 0, N, jnp.int32)
    params = init_params(k_p, input_dim, hidden_dim, bert_dim, num_classes)

    emb, logp = jax.jit(gnn_forward)(x, edge_index, params)
    jax.block_until_ready((emb, logp))

    assert emb.shape == (N, bert_dim)
    assert logp.shape == (N, num_classes)
    # log_softmax rows should sum to 1 in prob space
    assert jnp.allclose(jnp.sum(jnp.exp(logp), axis=1), 1.0, atol=1e-3)

    # pure-JAX f32 reference (bf16 A / streamed activations => loose tolerance)
    def ref_forward(x, edge_index, params):
        w1, b1, w2, b2, wc_t, bc = params
        n = x.shape[0]
        s, d = edge_index[0], edge_index[1]
        adj = jnp.zeros((n, n), jnp.float32).at[d, s].add((s != d).astype(jnp.float32))
        adj = adj.at[jnp.arange(n), jnp.arange(n)].add(1.0)
        deg = adj.sum(1)
        dinv = jnp.where(deg > 0, jax.lax.rsqrt(deg), 0.0)
        a = dinv[:, None] * adj * dinv[None, :]
        h1 = jnp.maximum(a @ (x @ w1) + b1, 0.0)
        h2 = jnp.maximum(a @ (h1 @ w2) + b2, 0.0)
        lg = h2 @ wc_t + bc
        return h2, jax.nn.log_softmax(lg, axis=1)

    emb_ref, logp_ref = ref_forward(x, edge_index, params)
    assert jnp.allclose(emb, emb_ref, atol=1e-1, rtol=1e-1)
    assert jnp.allclose(logp, logp_ref, atol=1e-1, rtol=1e-1)

    print("KERNEL_OK")
</pallas_src>

<mosaic_0001>
module attributes {stable_mosaic.version = 11 : i64} {
  func.func private @main(%arg0: i32) attributes {dimension_semantics = [#tpu.dimension_semantics<core_parallel>], iteration_bounds = array<i64: 2>, tpu.core_type = #tpu.core_type<sc_scalar_subcore>, window_params = []} {
    return
  }
}

module attributes {stable_mosaic.version = 11 : i64} {
  func.func private @main(%arg0: i32) attributes {dimension_semantics = [#tpu.dimension_semantics<core_parallel>], iteration_bounds = array<i64: 2>, tpu.core_type = #tpu.core_type<sc_scalar_subcore>, window_params = []} {
    return
  }
}

module attributes {stable_mosaic.version = 11 : i64} {
  func.func @_gcn_pass1_kernel(%arg0: i32, %arg1: i32, %arg2: memref<128x128xbf16, #tpu.memory_space<vmem>>, %arg3: memref<128x128xbf16, #tpu.memory_space<vmem>>, %arg4: memref<1x128xf32, #tpu.memory_space<vmem>>, %arg5: memref<128x128xf32, #tpu.memory_space<vmem>>, %arg6: memref<128x128xbf16, #tpu.memory_space<vmem>>, %arg7: memref<128x128xf32, #tpu.memory_space<vmem>>) attributes {dimension_semantics = [#tpu.dimension_semantics<parallel>, #tpu.dimension_semantics<arbitrary>], iteration_bounds = array<i64: 1, 1>, scalar_prefetch = 0 : i64, scratch_operands = 1 : i64, tpu.core_type = #tpu.core_type<tc>, window_params = [{transform_indices = @transform_0, window_bounds = array<i64: 128, 128>}, {transform_indices = @transform_1, window_bounds = array<i64: 128, 128>}, {pipeline_mode = #tpu.pipeline_mode<synchronous>, transform_indices = @transform_2, window_bounds = array<i64: 1, 128>}, {pipeline_mode = #tpu.pipeline_mode<synchronous>, transform_indices = @transform_3, window_bounds = array<i64: 128, 128>}, {transform_indices = @transform_4, window_bounds = array<i64: 128, 128>}]} {
    %c0_i32 = arith.constant 0 : i32
    %0 = arith.cmpi eq, %arg1, %c0_i32 : i32
    %1 = arith.extui %0 : i1 to i32
    %c0_i32_0 = arith.constant 0 : i32
    %2 = arith.cmpi ne, %1, %c0_i32_0 : i32
    scf.if %2 {
      %cst_10 = arith.constant 0.000000e+00 : f32
      %12 = vector.broadcast %cst_10 : f32 to vector<128x128xf32>
      %c0_11 = arith.constant 0 : index
      %c0_12 = arith.constant 0 : index
      %13 = vector.load %arg7[%c0_11, %c0_12] : memref<128x128xf32, #tpu.memory_space<vmem>>, vector<128x128xf32>
      tpu.vector_store %arg7[%c0_11, %c0_12], %12 {strides = array<i32>} : memref<128x128xf32, #tpu.memory_space<vmem>>, vector<128x128xf32>,
    } else {
    }
    %c0 = arith.constant 0 : index
    %c0_1 = arith.constant 0 : index
    %3 = vector.load %arg7[%c0, %c0_1] : memref<128x128xf32, #tpu.memory_space<vmem>>, vector<128x128xf32>
    %c0_2 = arith.constant 0 : index
    %c0_3 = arith.constant 0 : index
    %4 = vector.load %arg2[%c0_2, %c0_3] : memref<128x128xbf16, #tpu.memory_space<vmem>>, vector<128x128xbf16>
    %c0_4 = arith.constant 0 : index
    %c0_5 = arith.constant 0 : index
    %5 = vector.load %arg3[%c0_4, %c0_5] : memref<128x128xbf16, #tpu.memory_space<vmem>>, vector<128x128xbf16>
    %cst = arith.constant dense<0.000000e+00> : vector<128x128xf32>
    %6 = tpu.matmul %4, %5, %cst {dimension_numbers = #tpu.dot_dimension_numbers<[1], [0], [0], [1], [0, 0, 1, 1], [], []>} : vector<128x128xbf16>, vector<128x128xbf16>, vector<128x128xf32> -> vector<128x128xf32>
    %7 = arith.addf %3, %6 : vector<128x128xf32>
    %c0_6 = arith.constant 0 : index
    %c0_7 = arith.constant 0 : index
    %8 = vector.load %arg7[%c0_6, %c0_7] : memref<128x128xf32, #tpu.memory_space<vmem>>, vector<128x128xf32>
    tpu.vector_store %arg7[%c0_6, %c0_7], %7 {strides = array<i32>} : memref<128x128xf32, #tpu.memory_space<vmem>>, vector<128x128xf32>,
    %c0_i32_8 = arith.constant 0 : i32
    %9 = arith.cmpi eq, %arg1, %c0_i32_8 : i32
    %10 = arith.extui %9 : i1 to i32
    %c0_i32_9 = arith.constant 0 : i32
    %11 = arith.cmpi ne, %10, %c0_i32_9 : i32
    scf.if %11 {
      %c0_10 = arith.constant 0 : index
      %c0_11 = arith.constant 0 : index
      %12 = vector.load %arg7[%c0_10, %c0_11] : memref<128x128xf32, #tpu.memory_space<vmem>>, vector<128x128xf32>
      %c0_12 = arith.constant 0 : index
      %c0_13 = arith.constant 0 : index
      %13 = vector.load %arg4[%c0_12, %c0_13] : memref<1x128xf32, #tpu.memory_space<vmem>>, vector<1x128xf32>
      %14 = vector.broadcast %13 : vector<1x128xf32> to vector<128x128xf32>
      %15 = arith.addf %12, %14 : vector<128x128xf32>
      %cst_14 = arith.constant 0.000000e+00 : f32
      %16 = vector.broadcast %cst_14 : f32 to vector<128x128xf32>
      %17 = arith.maximumf %15, %16 : vector<128x128xf32>
      %c0_15 = arith.constant 0 : index
      %c0_16 = arith.constant 0 : index
      %18 = vector.load %arg5[%c0_15, %c0_16] : memref<128x128xf32, #tpu.memory_space<vmem>>, vector<128x128xf32>
      %cst_17 = arith.constant dense<0.000000e+00> : vector<128x128xf32>
      %19 = tpu.matmul %17, %18, %cst_17 {dimension_numbers = #tpu.dot_dimension_numbers<[1], [0], [0], [1], [0, 0, 1, 1], [], []>} : vector<128x128xf32>, vector<128x128xf32>, vector<128x128xf32> -> vector<128x128xf32>
      %20 = arith.truncf %19 : vector<128x128xf32> to vector<128x128xbf16>
      %c0_18 = arith.constant 0 : index
      %c0_19 = arith.constant 0 : index
      %21 = vector.load %arg6[%c0_18, %c0_19] : memref<128x128xbf16, #tpu.memory_space<vmem>>, vector<128x128xbf16>
      tpu.vector_store %arg6[%c0_18, %c0_19], %20 {strides = array<i32>} : memref<128x128xbf16, #tpu.memory_space<vmem>>, vector<128x128xbf16>,
    } else {
    }
    return
  }
  func.func @transform_0(%arg0: i32, %arg1: i32) -> (i32, i32) {
    %c0_i32 = arith.constant 0 : i32
    return %arg0, %arg1 : i32, i32
  }
  func.func @transform_1(%arg0: i32, %arg1: i32) -> (i32, i32) {
    %c0_i32 = arith.constant 0 : i32
    %c0_i32_0 = arith.constant 0 : i32
    return %arg1, %c0_i32 : i32, i32
  }
  func.func @transform_2(%arg0: i32, %arg1: i32) -> (i32, i32) {
    %c0_i32 = arith.constant 0 : i32
    %c0_i32_0 = arith.constant 0 : i32
    %c0_i32_1 = arith.constant 0 : i32
    return %c0_i32, %c0_i32_0 : i32, i32
  }
  func.func @transform_3(%arg0: i32, %arg1: i32) -> (i32, i32) {
    %c0_i32 = arith.constant 0 : i32
    %c0_i32_0 = arith.constant 0 : i32
    %c0_i32_1 = arith.constant 0 : i32
    return %c0_i32, %c0_i32_0 : i32, i32
  }
  func.func @transform_4(%arg0: i32, %arg1: i32) -> (i32, i32) {
    %c0_i32 = arith.constant 0 : i32
    %c0_i32_0 = arith.constant 0 : i32
    return %arg0, %c0_i32 : i32, i32
  }
}

module attributes {stable_mosaic.version = 11 : i64} {
  func.func @_gcn_pass2_kernel(%arg0: i32, %arg1: i32, %arg2: memref<128x128xbf16, #tpu.memory_space<vmem>>, %arg3: memref<128x128xbf16, #tpu.memory_space<vmem>>, %arg4: memref<1x128xf32, #tpu.memory_space<vmem>>, %arg5: memref<128x128xf32, #tpu.memory_space<vmem>>, %arg6: memref<1x128xf32, #tpu.memory_space<vmem>>, %arg7: memref<128x128xf32, #tpu.memory_space<vmem>>, %arg8: memref<128x128xf32, #tpu.memory_space<vmem>>, %arg9: memref<128x128xf32, #tpu.memory_space<vmem>>) attributes {dimension_semantics = [#tpu.dimension_semantics<parallel>, #tpu.dimension_semantics<arbitrary>], iteration_bounds = array<i64: 1, 1>, scalar_prefetch = 0 : i64, scratch_operands = 1 : i64, tpu.core_type = #tpu.core_type<tc>, window_params = [{transform_indices = @transform_0, window_bounds = array<i64: 128, 128>}, {transform_indices = @transform_1, window_bounds = array<i64: 128, 128>}, {pipeline_mode = #tpu.pipeline_mode<synchronous>, transform_indices = @transform_2, window_bounds = array<i64: 1, 128>}, {pipeline_mode = #tpu.pipeline_mode<synchronous>, transform_indices = @transform_3, window_bounds = array<i64: 128, 128>}, {pipeline_mode = #tpu.pipeline_mode<synchronous>, transform_indices = @transform_4, window_bounds = array<i64: 1, 128>}, {transform_indices = @transform_5, window_bounds = array<i64: 128, 128>}, {transform_indices = @transform_6, window_bounds = array<i64: 128, 128>}]} {
    %c0_i32 = arith.constant 0 : i32
    %0 = arith.cmpi eq, %arg1, %c0_i32 : i32
    %1 = arith.extui %0 : i1 to i32
    %c0_i32_0 = arith.constant 0 : i32
    %2 = arith.cmpi ne, %1, %c0_i32_0 : i32
    scf.if %2 {
      %cst_10 = arith.constant 0.000000e+00 : f32
      %12 = vector.broadcast %cst_10 : f32 to vector<128x128xf32>
      %c0_11 = arith.constant 0 : index
      %c0_12 = arith.constant 0 : index
      %13 = vector.load %arg9[%c0_11, %c0_12] : memref<128x128xf32, #tpu.memory_space<vmem>>, vector<128x128xf32>
      tpu.vector_store %arg9[%c0_11, %c0_12], %12 {strides = array<i32>} : memref<128x128xf32, #tpu.memory_space<vmem>>, vector<128x128xf32>,
    } else {
    }
    %c0 = arith.constant 0 : index
    %c0_1 = arith.constant 0 : index
    %3 = vector.load %arg9[%c0, %c0_1] : memref<128x128xf32, #tpu.memory_space<vmem>>, vector<128x128xf32>
    %c0_2 = arith.constant 0 : index
    %c0_3 = arith.constant 0 : index
    %4 = vector.load %arg2[%c0_2, %c0_3] : memref<128x128xbf16, #tpu.memory_space<vmem>>, vector<128x128xbf16>
    %c0_4 = arith.constant 0 : index
    %c0_5 = arith.constant 0 : index
    %5 = vector.load %arg3[%c0_4, %c0_5] : memref<128x128xbf16, #tpu.memory_space<vmem>>, vector<128x128xbf16>
    %cst = arith.constant dense<0.000000e+00> : vector<128x128xf32>
    %6 = tpu.matmul %4, %5, %cst {dimension_numbers = #tpu.dot_dimension_numbers<[1], [0], [0], [1], [0, 0, 1, 1], [], []>} : vector<128x128xbf16>, vector<128x128xbf16>, vector<128x128xf32> -> vector<128x128xf32>
    %7 = arith.addf %3, %6 : vector<128x128xf32>
    %c0_6 = arith.constant 0 : index
    %c0_7 = arith.constant 0 : index
    %8 = vector.load %arg9[%c0_6, %c0_7] : memref<128x128xf32, #tpu.memory_space<vmem>>, vector<128x128xf32>
    tpu.vector_store %arg9[%c0_6, %c0_7], %7 {strides = array<i32>} : memref<128x128xf32, #tpu.memory_space<vmem>>, vector<128x128xf32>,
    %c0_i32_8 = arith.constant 0 : i32
    %9 = arith.cmpi eq, %arg1, %c0_i32_8 : i32
    %10 = arith.extui %9 : i1 to i32
    %c0_i32_9 = arith.constant 0 : i32
    %11 = arith.cmpi ne, %10, %c0_i32_9 : i32
    scf.if %11 {
      %c0_10 = arith.constant 0 : index
      %c0_11 = arith.constant 0 : index
      %12 = vector.load %arg9[%c0_10, %c0_11] : memref<128x128xf32, #tpu.memory_space<vmem>>, vector<128x128xf32>
      %c0_12 = arith.constant 0 : index
      %c0_13 = arith.constant 0 : index
      %13 = vector.load %arg4[%c0_12, %c0_13] : memref<1x128xf32, #tpu.memory_space<vmem>>, vector<1x128xf32>
      %14 = vector.broadcast %13 : vector<1x128xf32> to vector<128x128xf32>
      %15 = arith.addf %12, %14 : vector<128x128xf32>
      %cst_14 = arith.constant 0.000000e+00 : f32
      %16 = vector.broadcast %cst_14 : f32 to vector<128x128xf32>
      %17 = arith.maximumf %15, %16 : vector<128x128xf32>
      %c0_15 = arith.constant 0 : index
      %c0_16 = arith.constant 0 : index
      %18 = vector.load %arg7[%c0_15, %c0_16] : memref<128x128xf32, #tpu.memory_space<vmem>>, vector<128x128xf32>
      tpu.vector_store %arg7[%c0_15, %c0_16], %17 {strides = array<i32>} : memref<128x128xf32, #tpu.memory_space<vmem>>, vector<128x128xf32>,
      %c0_17 = arith.constant 0 : index
      %c0_18 = arith.constant 0 : index
      %19 = vector.load %arg5[%c0_17, %c0_18] : memref<128x128xf32, #tpu.memory_space<vmem>>, vector<128x128xf32>
      %cst_19 = arith.constant dense<0.000000e+00> : vector<128x128xf32>
      %20 = tpu.matmul %17, %19, %cst_19 {dimension_numbers = #tpu.dot_dimension_numbers<[1], [0], [0], [1], [0, 0, 1, 1], [], []>} : vector<128x128xf32>, vector<128x128xf32>, vector<128x128xf32> -> vector<128x128xf32>
      %c0_20 = arith.constant 0 : index
      %c0_21 = arith.constant 0 : index
      %21 = vector.load %arg6[%c0_20, %c0_21] : memref<1x128xf32, #tpu.memory_space<vmem>>, vector<1x128xf32>
      %22 = vector.broadcast %21 : vector<1x128xf32> to vector<128x128xf32>
      %23 = arith.addf %20, %22 : vector<128x128xf32>
      %cst_22 = arith.constant dense<0xFF800000> : vector<128xf32>
      %24 = vector.multi_reduction <maximumf>, %23, %cst_22 [1] : vector<128x128xf32> to vector<128xf32>
      %25 = vector.shape_cast %24 : vector<128xf32> to vector<128x1xf32>
      %26 = vector.broadcast %25 : vector<128x1xf32> to vector<128x128xf32>
      %27 = arith.subf %23, %26 : vector<128x128xf32>
      %28 = math.exp %27 : vector<128x128xf32>
      %cst_23 = arith.constant dense<0.000000e+00> : vector<128xf32>
      %29 = vector.multi_reduction <add>, %28, %cst_23 [1] : vector<128x128xf32> to vector<128xf32>
      %30 = vector.shape_cast %29 : vector<128xf32> to vector<128x1xf32>
      %31 = math.log %30 : vector<128x1xf32>
      %32 = arith.addf %25, %31 : vector<128x1xf32>
      %33 = vector.broadcast %32 : vector<128x1xf32> to vector<128x128xf32>
      %34 = arith.subf %23, %33 : vector<128x128xf32>
      %c0_24 = arith.constant 0 : index
      %c0_25 = arith.constant 0 : index
      %35 = vector.load %arg8[%c0_24, %c0_25] : memref<128x128xf32, #tpu.memory_space<vmem>>, vector<128x128xf32>
      tpu.vector_store %arg8[%c0_24, %c0_25], %34 {strides = array<i32>} : memref<128x128xf32, #tpu.memory_space<vmem>>, vector<128x128xf32>,
    } else {
    }
    return
  }
  func.func @transform_0(%arg0: i32, %arg1: i32) -> (i32, i32) {
    %c0_i32 = arith.constant 0 : i32
    return %arg0, %arg1 : i32, i32
  }
  func.func @transform_1(%arg0: i32, %arg1: i32) -> (i32, i32) {
    %c0_i32 = arith.constant 0 : i32
    %c0_i32_0 = arith.constant 0 : i32
    return %arg1, %c0_i32 : i32, i32
  }
  func.func @transform_2(%arg0: i32, %arg1: i32) -> (i32, i32) {
    %c0_i32 = arith.constant 0 : i32
    %c0_i32_0 = arith.constant 0 : i32
    %c0_i32_1 = arith.constant 0 : i32
    return %c0_i32, %c0_i32_0 : i32, i32
  }
  func.func @transform_3(%arg0: i32, %arg1: i32) -> (i32, i32) {
    %c0_i32 = arith.constant 0 : i32
    %c0_i32_0 = arith.constant 0 : i32
    %c0_i32_1 = arith.constant 0 : i32
    return %c0_i32, %c0_i32_0 : i32, i32
  }
  func.func @transform_4(%arg0: i32, %arg1: i32) -> (i32, i32) {
    %c0_i32 = arith.constant 0 : i32
    %c0_i32_0 = arith.constant 0 : i32
    %c0_i32_1 = arith.constant 0 : i32
    return %c0_i32, %c0_i32_0 : i32, i32
  }
  func.func @transform_5(%arg0: i32, %arg1: i32) -> (i32, i32) {
    %c0_i32 = arith.constant 0 : i32
    %c0_i32_0 = arith.constant 0 : i32
    return %arg0, %c0_i32 : i32, i32
  }
  func.func @transform_6(%arg0: i32, %arg1: i32) -> (i32, i32) {
    %c0_i32 = arith.constant 0 : i32
    %c0_i32_0 = arith.constant 0 : i32
    return %arg0, %c0_i32 : i32, i32
  }
}

</mosaic_0001>

<bundles_post_ra>
// kernel: gnn_forward.2
= control target key start
LH: loop header
LB: loop body
LE: loop exit
PB: predicated region body
PF: predicated region fallthrough
CT: control target
= control target key end

     0   :  { %s1042_s1 = inlined_call_operand.vmem [shape: bf16[128,128], index: 1, kind: input, shape index: {}]   ;;  %s1043_s0 = inlined_call_operand.vmem [shape: bf16[128,128], index: 0, kind: input, shape index: {}]   ;;  %s1044_s3 = inlined_call_operand.vmem [shape: f32[128,128], index: 3, kind: input, shape index: {}]   ;;  %s1045_s2 = inlined_call_operand.vmem [shape: f32[1,128], index: 2, kind: input, shape index: {}]   ;;  %s1046_s4 = inlined_call_operand.vmem [shape: bf16[128,128], index: 4, kind: output, shape index: {}]  }
   0x1   :  { %v878_v0 = vld [vmem:[%s1042_s1] sm:$0xff]   ;;  %v879_v1 = vld [vmem:[%s1042_s1 + $0x8] sm:$0xff]   ;;  %v880_v2 = vld [vmem:[%s1042_s1 + $0x10] sm:$0xff]  }
   0x2   :  { %758 = vmatprep.subr.bf16.mxu0 %v878_v0  ;;  %v881_v3 = vld [vmem:[%s1042_s1 + $0x18] sm:$0xff]   ;;  %v886_v4 = vld [vmem:[%s1043_s0] sm:$0xff]   ;;  %v883_v6 = vld [vmem:[%s1042_s1 + $0x28] sm:$0xff]  }
   0x3   :  { %759 = vmatpush3.bf16.msra.mxu0 %v878_v0  ;;  %774 = vmatprep.mubr.bf16.mxu0 %v886_v4  ;;  %v882_v5 = vld [vmem:[%s1042_s1 + $0x20] sm:$0xff]   ;;  %v370_v8 = vld [vmem:[%s1044_s3 + $0x8] sm:$0xff]  ;;  %v371_v9 = vld [vmem:[%s1044_s3 + $0x10] sm:$0xff] }
   0x4   :  { %760 = vmatprep.subr.bf16.mxu0 %v879_v1  ;;  %v369_v7 = vld [vmem:[%s1044_s3] sm:$0xff]  ;;  %v372_v11 = vld [vmem:[%s1044_s3 + $0x18] sm:$0xff]  ;;  %v374_v14 = vld [vmem:[%s1044_s3 + $0x28] sm:$0xff] }
   0x5   :  { %v846_v10 = vpack.c.bf16 %v370_v8, %v369_v7  ;;  %v850_v12 = vpack.c.bf16 %v372_v11, %v371_v9  ;;  %v373_v13 = vld [vmem:[%s1044_s3 + $0x20] sm:$0xff]  ;;  %v884_v15 = vld [vmem:[%s1042_s1 + $0x30] sm:$0xff]   ;;  %v376_v18 = vld [vmem:[%s1044_s3 + $0x38] sm:$0xff] }
   0x6   :  { %v854_v16 = vpack.c.bf16 %v374_v14, %v373_v13  ;;  %v375_v17 = vld [vmem:[%s1044_s3 + $0x30] sm:$0xff]  ;;  %v885_v19 = vld [vmem:[%s1042_s1 + $0x38] sm:$0xff]   ;;  %v377_v21 = vld [vmem:[%s1044_s3 + $0x40] sm:$0xff] }
   0x7   :  { %761 = vmatpush3.bf16.msra.mxu0 %v879_v1  ;;  %847 = vmatprep.subr.bf16.mxu1 %v846_v10  ;;  %v858_v20 = vpack.c.bf16 %v376_v18, %v375_v17  ;;  %v378_v22 = vld [vmem:[%s1044_s3 + $0x48] sm:$0xff]  ;;  %v379_v25 = vld [vmem:[%s1044_s3 + $0x50] sm:$0xff]  ;;  %v380_v26 = vld [vmem:[%s1044_s3 + $0x58] sm:$0xff] }
   0x8   :  { %762 = vmatprep.subr.bf16.mxu0 %v880_v2  ;;  %849 = vmatpush3.bf16.msra.mxu1 %v846_v10  ;;  %v862_v23 = vpack.c.bf16 %v378_v22, %v377_v21  ;;  %v887_v24 = vld [vmem:[%s1043_s0 + $0x8] sm:$0xff]   ;;  %v888_v27 = vld [vmem:[%s1043_s0 + $0x10] sm:$0xff]   ;;  %v866_v28 = vpack.c.bf16 %v380_v26, %v379_v25  ;;  %v889_v29 = vld [vmem:[%s1043_s0 + $0x18] sm:$0xff]  }
   0x9   :  { %851 = vmatprep.subr.bf16.mxu1 %v850_v12  ;;  %v890_v30 = vld [vmem:[%s1043_s0 + $0x20] sm:$0xff]   ;;  %v891_v31 = vld [vmem:[%s1043_s0 + $0x28] sm:$0xff]   ;;  %v892_v32 = vld [vmem:[%s1043_s0 + $0x30] sm:$0xff]  }
   0xa   :  { %v893_v33 = vld [vmem:[%s1043_s0 + $0x38] sm:$0xff]   ;;  %v381_v34 = vld [vmem:[%s1044_s3 + $0x60] sm:$0xff]  ;;  %v382_v35 = vld [vmem:[%s1044_s3 + $0x68] sm:$0xff] }
   0xb   :  { %763 = vmatpush3.bf16.msra.mxu0 %v880_v2  ;;  %v870_v36 = vpack.c.bf16 %v382_v35, %v381_v34  ;;  %v383_v37 = vld [vmem:[%s1044_s3 + $0x70] sm:$0xff]  ;;  %v384_v38 = vld [vmem:[%s1044_s3 + $0x78] sm:$0xff]  ;;  %v630_v40 = vld [vmem:[%s1045_s2] ss:$0 sm:$0xff] }
   0xc   :  { %764 = vmatprep.subr.bf16.mxu0 %v881_v3  ;;  %853 = vmatpush3.bf16.msra.mxu1 %v850_v12  ;;  %v874_v39 = vpack.c.bf16 %v384_v38, %v383_v37 }
   0xd   :  { %855 = vmatprep.subr.bf16.mxu1 %v854_v16 }
   0xf   :  { %765 = vmatpush3.bf16.msra.mxu0 %v881_v3 }
  0x10   :  { %766 = vmatprep.subr.bf16.mxu0 %v882_v5  ;;  %857 = vmatpush3.bf16.msra.mxu1 %v854_v16 }
  0x11   :  { %859 = vmatprep.subr.bf16.mxu1 %v858_v20 }
  0x13   :  { %767 = vmatpush3.bf16.msra.mxu0 %v882_v5 }
  0x14   :  { %768 = vmatprep.subr.bf16.mxu0 %v883_v6  ;;  %861 = vmatpush3.bf16.msra.mxu1 %v858_v20 }
  0x15   :  { %863 = vmatprep.subr.bf16.mxu1 %v862_v23 }
  0x17   :  { %769 = vmatpush3.bf16.msra.mxu0 %v883_v6 }
  0x18   :  { %770 = vmatprep.subr.bf16.mxu0 %v884_v15  ;;  %865 = vmatpush3.bf16.msra.mxu1 %v862_v23 }
  0x19   :  { %867 = vmatprep.subr.bf16.mxu1 %v866_v28 }
  0x1b   :  { %771 = vmatpush3.bf16.msra.mxu0 %v884_v15 }
  0x1c   :  { %772 = vmatprep.subr.bf16.mxu0 %v885_v19  ;;  %869 = vmatpush3.bf16.msra.mxu1 %v866_v28 }
  0x1d   :  { %871 = vmatprep.subr.bf16.mxu1 %v870_v36 }
  0x1f   :  { %773 = vmatpush3.bf16.msra.mxu0 %v885_v19 }
  0x20   :  { %873 = vmatpush3.bf16.msra.mxu1 %v870_v36 }
  0x21   :  { %875 = vmatprep.subr.bf16.mxu1 %v874_v39 }
  0x22   :  { %775 = vmatmul.mubr.bf16.vlgmr.msra.gmra.mrb[0].mxu0 %v887_v24 }
  0x23   :  { %778 = vmatprep.mubr.bf16.mxu0 %v888_v27 }
  0x24   :  { %877 = vmatpush3.bf16.msra.mxu1 %v874_v39 }
  0x2a   :  { %779 = vmatmul.mubr.bf16.gmra.mrb[4].mxu0 %v889_v29 }
  0x2b   :  { %782 = vmatprep.mubr.bf16.mxu0 %v890_v30 }
  0x32   :  { %783 = vmatmul.mubr.bf16.gmra.mrb[8].mxu0 %v891_v31 }
  0x33   :  { %786 = vmatprep.mubr.bf16.mxu0 %v892_v32 }
  0x3a   :  { %787 = vmatmul.mubr.bf16.gmra.mrb[12].mxu0 %v893_v33 }
  0xf5   :  { %v776_v41 = vpop.f32.mrb[0].mxu0 }
  0xf6   :  { %v216_v42 = vpop.f32.mrb[1].mxu0  ;;  %v339_v45 = vadd.f32 %v776_v41, %v630_v40 }
  0xf7   :  { %v777_v43 = vpop.f32.mrb[2].mxu0  ;;  %v337_v44 = vadd.f32 %v630_v40, %v216_v42 }
  0xf8   :  { %v219_v46 = vpop.f32.mrb[3].mxu0  ;;  %v340_v49 = vadd.f32 %v777_v43, %v630_v40  ;;  %v355_v51 = vmax.f32 %v339_v45, 0.0 }
  0xf9   :  { %v338_v47 = vadd.f32 %v630_v40, %v219_v46  ;;  %v353_v48 = vmax.f32 %v337_v44, 0.0 }
  0xfa   :  { %v356_v54 = vmax.f32 %v340_v49, 0.0 }
  0xfb   :  { %v354_v50 = vmax.f32 %v338_v47, 0.0  ;;  %822 = vmatprep.mubr.f32.mxu1 %v353_v48 }
  0xfd   :  { %v780_v52 = vpop.f32.mrb[4].mxu0  ;;  %823 = vmatmul.mubr.f32.vlgmr.msra.gmra.mrb[0].mxu1 %v354_v50 }
  0xfe   :  { %v232_v53 = vpop.f32.mrb[5].mxu0  ;;  %825 = vmatprep.mubr.f32.mxu1 %v355_v51  ;;  %v343_v57 = vadd.f32 %v780_v52, %v630_v40 }
  0xff   :  { %v341_v55 = vadd.f32 %v630_v40, %v232_v53  ;;  %v781_v56 = vpop.f32.mrb[6].mxu0 }
 0x100   :  { %v235_v58 = vpop.f32.mrb[7].mxu0  ;;  %v344_v61 = vadd.f32 %v781_v56, %v630_v40  ;;  %v359_v63 = vmax.f32 %v343_v57, 0.0 }
 0x101   :  { %v357_v59 = vmax.f32 %v341_v55, 0.0  ;;  %v342_v60 = vadd.f32 %v630_v40, %v235_v58  ;;  %826 = vmatmul.mubr.f32.gmra.mrb[2].mxu1 %v356_v54 }
 0x102   :  { %v360_v2 = vmax.f32 %v344_v61, 0.0 }
 0x103   :  { %v358_v62 = vmax.f32 %v342_v60, 0.0  ;;  %828 = vmatprep.mubr.f32.mxu1 %v357_v59 }
 0x105   :  { %v784_v0 = vpop.f32.mrb[8].mxu0  ;;  %829 = vmatmul.mubr.f32.gmra.mrb[4].mxu1 %v358_v62 }
 0x106   :  { %v248_v1 = vpop.f32.mrb[9].mxu0  ;;  %831 = vmatprep.mubr.f32.mxu1 %v359_v63  ;;  %v347_v5 = vadd.f32 %v784_v0, %v630_v40 }
 0x107   :  { %v345_v3 = vadd.f32 %v630_v40, %v248_v1  ;;  %v785_v4 = vpop.f32.mrb[10].mxu0 }
 0x108   :  { %v251_v6 = vpop.f32.mrb[11].mxu0  ;;  %v348_v9 = vadd.f32 %v785_v4, %v630_v40  ;;  %v363_v11 = vmax.f32 %v347_v5, 0.0 }
 0x109   :  { %v361_v7 = vmax.f32 %v345_v3, 0.0  ;;  %v346_v8 = vadd.f32 %v630_v40, %v251_v6  ;;  %832 = vmatmul.mubr.f32.gmra.mrb[6].mxu1 %v360_v2 }
 0x10a   :  { %v364_v14 = vmax.f32 %v348_v9, 0.0 }
 0x10b   :  { %v362_v10 = vmax.f32 %v346_v8, 0.0  ;;  %834 = vmatprep.mubr.f32.mxu1 %v361_v7 }
 0x10d   :  { %v788_v12 = vpop.f32.mrb[12].mxu0  ;;  %835 = vmatmul.mubr.f32.gmra.mrb[8].mxu1 %v362_v10 }
 0x10e   :  { %v264_v13 = vpop.f32.mrb[13].mxu0  ;;  %837 = vmatprep.mubr.f32.mxu1 %v363_v11  ;;  %v351_v17 = vadd.f32 %v788_v12, %v630_v40 }
 0x10f   :  { %v349_v15 = vadd.f32 %v630_v40, %v264_v13  ;;  %v789_v16 = vpop.f32.mrb[14].mxu0 }
 0x110   :  { %v267_v18 = vpop.f32.mrb[15].mxu0  ;;  %v352_v21 = vadd.f32 %v789_v16, %v630_v40  ;;  %v367_v23 = vmax.f32 %v351_v17, 0.0 }
 0x111   :  { %v365_v19 = vmax.f32 %v349_v15, 0.0  ;;  %v350_v20 = vadd.f32 %v630_v40, %v267_v18  ;;  %838 = vmatmul.mubr.f32.gmra.mrb[10].mxu1 %v364_v14 }
 0x112   :  { %v368_v24 = vmax.f32 %v352_v21, 0.0 }
 0x113   :  { %v366_v22 = vmax.f32 %v350_v20, 0.0  ;;  %840 = vmatprep.mubr.f32.mxu1 %v365_v19 }
 0x115   :  { %841 = vmatmul.mubr.f32.gmra.mrb[12].mxu1 %v366_v22 }
 0x116   :  { %843 = vmatprep.mubr.f32.mxu1 %v367_v23 }
 0x119   :  { %844 = vmatmul.mubr.f32.gmra.mrb[14].mxu1 %v368_v24 }
 0x1d0   :  { %v824_v25 = vpop.f32.mrb[0].mxu1 }
 0x1d1   :  { %v451_v26 = vpop.f32.mrb[1].mxu1 }
 0x1d2   :  { %v666_v27 = vpack.c.bf16 %v824_v25, %v451_v26 }
 0x1d4   :  { %667 = vst [vmem:[%s1046_s4] sm:$0xff] %v666_v27   ;;  %v827_v28 = vpop.f32.mrb[2].mxu1 }
 0x1d5   :  { %v461_v29 = vpop.f32.mrb[3].mxu1 }
 0x1d6   :  { %v671_v30 = vpack.c.bf16 %v827_v28, %v461_v29 }
 0x1d8   :  { %703 = vst [vmem:[%s1046_s4 + $0x8] sm:$0xff] %v671_v30   ;;  %v830_v31 = vpop.f32.mrb[4].mxu1 }
 0x1d9   :  { %v471_v32 = vpop.f32.mrb[5].mxu1 }
 0x1da   :  { %v676_v33 = vpack.c.bf16 %v830_v31, %v471_v32 }
 0x1dc   :  { %704 = vst [vmem:[%s1046_s4 + $0x10] sm:$0xff] %v676_v33   ;;  %v833_v34 = vpop.f32.mrb[6].mxu1 }
 0x1dd   :  { %v481_v35 = vpop.f32.mrb[7].mxu1 }
 0x1de   :  { %v681_v36 = vpack.c.bf16 %v833_v34, %v481_v35 }
 0x1e0   :  { %705 = vst [vmem:[%s1046_s4 + $0x18] sm:$0xff] %v681_v36   ;;  %v836_v37 = vpop.f32.mrb[8].mxu1 }
 0x1e1   :  { %v491_v38 = vpop.f32.mrb[9].mxu1 }
 0x1e2   :  { %v686_v39 = vpack.c.bf16 %v836_v37, %v491_v38 }
 0x1e4   :  { %706 = vst [vmem:[%s1046_s4 + $0x20] sm:$0xff] %v686_v39   ;;  %v839_v40 = vpop.f32.mrb[10].mxu1 }
 0x1e5   :  { %v501_v41 = vpop.f32.mrb[11].mxu1 }
 0x1e6   :  { %v691_v42 = vpack.c.bf16 %v839_v40, %v501_v41 }
 0x1e8   :  { %707 = vst [vmem:[%s1046_s4 + $0x28] sm:$0xff] %v691_v42   ;;  %v842_v43 = vpop.f32.mrb[12].mxu1 }
 0x1e9   :  { %v511_v44 = vpop.f32.mrb[13].mxu1 }
 0x1ea   :  { %v696_v45 = vpack.c.bf16 %v842_v43, %v511_v44 }
 0x1ec   :  { %708 = vst [vmem:[%s1046_s4 + $0x30] sm:$0xff] %v696_v45   ;;  %v845_v46 = vpop.f32.mrb[14].mxu1 }
 0x1ed   :  { %v521_v47 = vpop.f32.mrb[15].mxu1 }
 0x1ee   :  { %v701_v48 = vpack.c.bf16 %v845_v46, %v521_v47 }
 0x1f0   :  { %709 = vst [vmem:[%s1046_s4 + $0x38] sm:$0xff] %v701_v48  }

// kernel: gnn_forward.3
= control target key start
LH: loop header
LB: loop body
LE: loop exit
PB: predicated region body
PF: predicated region fallthrough
CT: control target
= control target key end

     0   :  { %s1419_s1 = inlined_call_operand.vmem [shape: bf16[128,128], index: 1, kind: input, shape index: {}]   ;;  %s1420_s0 = inlined_call_operand.vmem [shape: bf16[128,128], index: 0, kind: input, shape index: {}]   ;;  %s1421_s3 = inlined_call_operand.vmem [shape: f32[128,128], index: 3, kind: input, shape index: {}]   ;;  %s1422_s2 = inlined_call_operand.vmem [shape: f32[1,128], index: 2, kind: input, shape index: {}]   ;;  %s1423_s5 = inlined_call_operand.vmem [shape: f32[128,128], index: 5, kind: output, shape index: {0}]   ;;  %s1424_s4 = inlined_call_operand.vmem [shape: f32[1,128], index: 4, kind: input, shape index: {}]   ;;  %s1425_s6 = inlined_call_operand.vmem [shape: f32[128,128], index: 6, kind: output, shape index: {1}]  }
   0x1   :  { %v944_v0 = vld [vmem:[%s1419_s1] sm:$0xff]   ;;  %v945_v1 = vld [vmem:[%s1419_s1 + $0x8] sm:$0xff]   ;;  %v946_v2 = vld [vmem:[%s1419_s1 + $0x10] sm:$0xff]  }
   0x2   :  { %824 = vmatprep.subr.bf16.mxu0 %v944_v0  ;;  %v947_v3 = vld [vmem:[%s1419_s1 + $0x18] sm:$0xff]   ;;  %v952_v4 = vld [vmem:[%s1420_s0] sm:$0xff]   ;;  %v949_v6 = vld [vmem:[%s1419_s1 + $0x28] sm:$0xff]  }
   0x3   :  { %825 = vmatpush3.bf16.msra.mxu0 %v944_v0  ;;  %840 = vmatprep.mubr.bf16.mxu0 %v952_v4  ;;  %v948_v5 = vld [vmem:[%s1419_s1 + $0x20] sm:$0xff]   ;;  %v391_v8 = vld [vmem:[%s1421_s3 + $0x8] sm:$0xff]  ;;  %v392_v9 = vld [vmem:[%s1421_s3 + $0x10] sm:$0xff] }
   0x4   :  { %826 = vmatprep.subr.bf16.mxu0 %v945_v1  ;;  %v390_v7 = vld [vmem:[%s1421_s3] sm:$0xff]  ;;  %v393_v11 = vld [vmem:[%s1421_s3 + $0x18] sm:$0xff]  ;;  %v395_v14 = vld [vmem:[%s1421_s3 + $0x28] sm:$0xff] }
   0x5   :  { %v912_v10 = vpack.c.bf16 %v391_v8, %v390_v7  ;;  %v916_v12 = vpack.c.bf16 %v393_v11, %v392_v9  ;;  %v394_v13 = vld [vmem:[%s1421_s3 + $0x20] sm:$0xff]  ;;  %v950_v15 = vld [vmem:[%s1419_s1 + $0x30] sm:$0xff]   ;;  %v397_v18 = vld [vmem:[%s1421_s3 + $0x38] sm:$0xff] }
   0x6   :  { %v920_v16 = vpack.c.bf16 %v395_v14, %v394_v13  ;;  %v396_v17 = vld [vmem:[%s1421_s3 + $0x30] sm:$0xff]  ;;  %v951_v19 = vld [vmem:[%s1419_s1 + $0x38] sm:$0xff]   ;;  %v398_v21 = vld [vmem:[%s1421_s3 + $0x40] sm:$0xff] }
   0x7   :  { %827 = vmatpush3.bf16.msra.mxu0 %v945_v1  ;;  %913 = vmatprep.subr.bf16.mxu1 %v912_v10  ;;  %v924_v20 = vpack.c.bf16 %v397_v18, %v396_v17  ;;  %v399_v22 = vld [vmem:[%s1421_s3 + $0x48] sm:$0xff]  ;;  %v400_v25 = vld [vmem:[%s1421_s3 + $0x50] sm:$0xff]  ;;  %v401_v26 = vld [vmem:[%s1421_s3 + $0x58] sm:$0xff] }
   0x8   :  { %828 = vmatprep.subr.bf16.mxu0 %v946_v2  ;;  %915 = vmatpush3.bf16.msra.mxu1 %v912_v10  ;;  %v928_v23 = vpack.c.bf16 %v399_v22, %v398_v21  ;;  %v953_v24 = vld [vmem:[%s1420_s0 + $0x8] sm:$0xff]   ;;  %v954_v27 = vld [vmem:[%s1420_s0 + $0x10] sm:$0xff]   ;;  %v932_v28 = vpack.c.bf16 %v401_v26, %v400_v25  ;;  %v955_v29 = vld [vmem:[%s1420_s0 + $0x18] sm:$0xff]  }
   0x9   :  { %917 = vmatprep.subr.bf16.mxu1 %v916_v12  ;;  %v956_v30 = vld [vmem:[%s1420_s0 + $0x20] sm:$0xff]   ;;  %v957_v31 = vld [vmem:[%s1420_s0 + $0x28] sm:$0xff]   ;;  %v958_v32 = vld [vmem:[%s1420_s0 + $0x30] sm:$0xff]  }
   0xa   :  { %v959_v33 = vld [vmem:[%s1420_s0 + $0x38] sm:$0xff]   ;;  %v402_v34 = vld [vmem:[%s1421_s3 + $0x60] sm:$0xff]  ;;  %v403_v35 = vld [vmem:[%s1421_s3 + $0x68] sm:$0xff] }
   0xb   :  { %829 = vmatpush3.bf16.msra.mxu0 %v946_v2  ;;  %v936_v36 = vpack.c.bf16 %v403_v35, %v402_v34  ;;  %v404_v37 = vld [vmem:[%s1421_s3 + $0x70] sm:$0xff]  ;;  %v405_v38 = vld [vmem:[%s1421_s3 + $0x78] sm:$0xff]  ;;  %v1158_v40 = vld [vmem:[%s1422_s2] ss:$0 sm:$0xff] }
   0xc   :  { %830 = vmatprep.subr.bf16.mxu0 %v947_v3  ;;  %919 = vmatpush3.bf16.msra.mxu1 %v916_v12  ;;  %v940_v39 = vpack.c.bf16 %v405_v38, %v404_v37  ;;  %v775_v25 = vld [vmem:[%s1424_s4] ss:$0 sm:$0xff] }
   0xd   :  { %921 = vmatprep.subr.bf16.mxu1 %v920_v16 }
   0xf   :  { %831 = vmatpush3.bf16.msra.mxu0 %v947_v3 }
  0x10   :  { %832 = vmatprep.subr.bf16.mxu0 %v948_v5  ;;  %923 = vmatpush3.bf16.msra.mxu1 %v920_v16 }
  0x11   :  { %925 = vmatprep.subr.bf16.mxu1 %v924_v20 }
  0x13   :  { %833 = vmatpush3.bf16.msra.mxu0 %v948_v5 }
  0x14   :  { %834 = vmatprep.subr.bf16.mxu0 %v949_v6  ;;  %927 = vmatpush3.bf16.msra.mxu1 %v924_v20 }
  0x15   :  { %929 = vmatprep.subr.bf16.mxu1 %v928_v23 }
  0x17   :  { %835 = vmatpush3.bf16.msra.mxu0 %v949_v6 }
  0x18   :  { %836 = vmatprep.subr.bf16.mxu0 %v950_v15  ;;  %931 = vmatpush3.bf16.msra.mxu1 %v928_v23 }
  0x19   :  { %933 = vmatprep.subr.bf16.mxu1 %v932_v28 }
  0x1b   :  { %837 = vmatpush3.bf16.msra.mxu0 %v950_v15 }
  0x1c   :  { %838 = vmatprep.subr.bf16.mxu0 %v951_v19  ;;  %935 = vmatpush3.bf16.msra.mxu1 %v932_v28 }
  0x1d   :  { %937 = vmatprep.subr.bf16.mxu1 %v936_v36 }
  0x1f   :  { %839 = vmatpush3.bf16.msra.mxu0 %v951_v19 }
  0x20   :  { %939 = vmatpush3.bf16.msra.mxu1 %v936_v36 }
  0x21   :  { %941 = vmatprep.subr.bf16.mxu1 %v940_v39 }
  0x22   :  { %841 = vmatmul.mubr.bf16.vlgmr.msra.gmra.mrb[0].mxu0 %v953_v24 }
  0x23   :  { %844 = vmatprep.mubr.bf16.mxu0 %v954_v27 }
  0x24   :  { %943 = vmatpush3.bf16.msra.mxu1 %v940_v39 }
  0x2a   :  { %845 = vmatmul.mubr.bf16.gmra.mrb[4].mxu0 %v955_v29 }
  0x2b   :  { %848 = vmatprep.mubr.bf16.mxu0 %v956_v30 }
  0x32   :  { %849 = vmatmul.mubr.bf16.gmra.mrb[8].mxu0 %v957_v31 }
  0x33   :  { %852 = vmatprep.mubr.bf16.mxu0 %v958_v32 }
  0x3a   :  { %853 = vmatmul.mubr.bf16.gmra.mrb[12].mxu0 %v959_v33 }
  0xf5   :  { %v842_v41 = vpop.f32.mrb[0].mxu0 }
  0xf6   :  { %v344_v42 = vadd.f32 %v842_v41, %v1158_v40  ;;  %v221_v43 = vpop.f32.mrb[1].mxu0 }
  0xf7   :  { %v342_v44 = vadd.f32 %v1158_v40, %v221_v43  ;;  %v843_v45 = vpop.f32.mrb[2].mxu0 }
  0xf8   :  { %v360_v46 = vmax.f32 %v344_v42, 0.0  ;;  %v345_v47 = vadd.f32 %v843_v45, %v1158_v40  ;;  %v224_v48 = vpop.f32.mrb[3].mxu0 }
  0xf9   :  { %v358_v49 = vmax.f32 %v342_v44, 0.0  ;;  %v343_v50 = vadd.f32 %v1158_v40, %v224_v48 }
  0xfa   :  { %376 = vst [vmem:[%s1423_s5 + $0x10] sm:$0xff] %v360_v46  ;;  %v361_v51 = vmax.f32 %v345_v47, 0.0 }
  0xfb   :  { %374 = vst [vmem:[%s1423_s5] sm:$0xff] %v358_v49  ;;  %v359_v52 = vmax.f32 %v343_v50, 0.0  ;;  %888 = vmatprep.mubr.f32.mxu1 %v358_v49 }
  0xfc   :  { %377 = vst [vmem:[%s1423_s5 + $0x18] sm:$0xff] %v361_v51 }
  0xfd   :  { %375 = vst [vmem:[%s1423_s5 + $0x8] sm:$0xff] %v359_v52  ;;  %v846_v53 = vpop.f32.mrb[4].mxu0  ;;  %889 = vmatmul.mubr.f32.vlgmr.msra.gmra.mrb[0].mxu1 %v359_v52 }
  0xfe   :  { %v348_v54 = vadd.f32 %v846_v53, %v1158_v40  ;;  %v237_v55 = vpop.f32.mrb[5].mxu0  ;;  %891 = vmatprep.mubr.f32.mxu1 %v360_v46 }
  0xff   :  { %v346_v56 = vadd.f32 %v1158_v40, %v237_v55  ;;  %v847_v57 = vpop.f32.mrb[6].mxu0 }
 0x100   :  { %v364_v58 = vmax.f32 %v348_v54, 0.0  ;;  %v349_v59 = vadd.f32 %v847_v57, %v1158_v40  ;;  %v240_v60 = vpop.f32.mrb[7].mxu0 }
 0x101   :  { %v362_v61 = vmax.f32 %v346_v56, 0.0  ;;  %v347_v62 = vadd.f32 %v1158_v40, %v240_v60  ;;  %892 = vmatmul.mubr.f32.gmra.mrb[2].mxu1 %v361_v51 }
 0x102   :  { %380 = vst [vmem:[%s1423_s5 + $0x30] sm:$0xff] %v364_v58  ;;  %v365_v63 = vmax.f32 %v349_v59, 0.0 }
 0x103   :  { %378 = vst [vmem:[%s1423_s5 + $0x20] sm:$0xff] %v362_v61  ;;  %v363_v0 = vmax.f32 %v347_v62, 0.0  ;;  %894 = vmatprep.mubr.f32.mxu1 %v362_v61 }
 0x104   :  { %381 = vst [vmem:[%s1423_s5 + $0x38] sm:$0xff] %v365_v63 }
 0x105   :  { %379 = vst [vmem:[%s1423_s5 + $0x28] sm:$0xff] %v363_v0  ;;  %v850_v1 = vpop.f32.mrb[8].mxu0  ;;  %895 = vmatmul.mubr.f32.gmra.mrb[4].mxu1 %v363_v0 }
 0x106   :  { %v352_v2 = vadd.f32 %v850_v1, %v1158_v40  ;;  %v253_v3 = vpop.f32.mrb[9].mxu0  ;;  %897 = vmatprep.mubr.f32.mxu1 %v364_v58 }
 0x107   :  { %v350_v4 = vadd.f32 %v1158_v40, %v253_v3  ;;  %v851_v5 = vpop.f32.mrb[10].mxu0 }
 0x108   :  { %v368_v6 = vmax.f32 %v352_v2, 0.0  ;;  %v353_v7 = vadd.f32 %v851_v5, %v1158_v40  ;;  %v256_v8 = vpop.f32.mrb[11].mxu0 }
 0x109   :  { %v366_v9 = vmax.f32 %v350_v4, 0.0  ;;  %v351_v10 = vadd.f32 %v1158_v40, %v256_v8  ;;  %898 = vmatmul.mubr.f32.gmra.mrb[6].mxu1 %v365_v63 }
 0x10a   :  { %384 = vst [vmem:[%s1423_s5 + $0x50] sm:$0xff] %v368_v6  ;;  %v369_v11 = vmax.f32 %v353_v7, 0.0 }
 0x10b   :  { %382 = vst [vmem:[%s1423_s5 + $0x40] sm:$0xff] %v366_v9  ;;  %v367_v12 = vmax.f32 %v351_v10, 0.0  ;;  %900 = vmatprep.mubr.f32.mxu1 %v366_v9 }
 0x10c   :  { %385 = vst [vmem:[%s1423_s5 + $0x58] sm:$0xff] %v369_v11 }
 0x10d   :  { %383 = vst [vmem:[%s1423_s5 + $0x48] sm:$0xff] %v367_v12  ;;  %v854_v13 = vpop.f32.mrb[12].mxu0  ;;  %901 = vmatmul.mubr.f32.gmra.mrb[8].mxu1 %v367_v12 }
 0x10e   :  { %v356_v14 = vadd.f32 %v854_v13, %v1158_v40  ;;  %v269_v15 = vpop.f32.mrb[13].mxu0  ;;  %903 = vmatprep.mubr.f32.mxu1 %v368_v6 }
 0x10f   :  { %v354_v16 = vadd.f32 %v1158_v40, %v269_v15  ;;  %v855_v17 = vpop.f32.mrb[14].mxu0 }
 0x110   :  { %v372_v18 = vmax.f32 %v356_v14, 0.0  ;;  %v357_v19 = vadd.f32 %v855_v17, %v1158_v40  ;;  %v272_v20 = vpop.f32.mrb[15].mxu0 }
 0x111   :  { %v370_v21 = vmax.f32 %v354_v16, 0.0  ;;  %v355_v22 = vadd.f32 %v1158_v40, %v272_v20  ;;  %904 = vmatmul.mubr.f32.gmra.mrb[10].mxu1 %v369_v11 }
 0x112   :  { %388 = vst [vmem:[%s1423_s5 + $0x70] sm:$0xff] %v372_v18  ;;  %v373_v23 = vmax.f32 %v357_v19, 0.0 }
 0x113   :  { %386 = vst [vmem:[%s1423_s5 + $0x60] sm:$0xff] %v370_v21  ;;  %v371_v24 = vmax.f32 %v355_v22, 0.0  ;;  %906 = vmatprep.mubr.f32.mxu1 %v370_v21 }
 0x114   :  { %389 = vst [vmem:[%s1423_s5 + $0x78] sm:$0xff] %v373_v23 }
 0x115   :  { %387 = vst [vmem:[%s1423_s5 + $0x68] sm:$0xff] %v371_v24  ;;  %907 = vmatmul.mubr.f32.gmra.mrb[12].mxu1 %v371_v24 }
 0x116   :  { %909 = vmatprep.mubr.f32.mxu1 %v372_v18 }
 0x119   :  { %910 = vmatmul.mubr.f32.gmra.mrb[14].mxu1 %v373_v23 }
 0x1d0   :  { %v890_v26 = vpop.f32.mrb[0].mxu1 }
 0x1d1   :  { %v1227_v27 = vadd.f32 %v890_v26, %v775_v25  ;;  %v479_v28 = vpop.f32.mrb[1].mxu1 }
 0x1d2   :  { %v1230_v30 = vadd.f32 %v775_v25, %v479_v28 }
 0x1d3   :  { %560 = vmax.xlane.f32.xlu0 %v1227_v27 }
 0x1d4   :  { %v893_v29 = vpop.f32.mrb[2].mxu1 }
 0x1d5   :  { %v1232_v31 = vadd.f32 %v893_v29, %v775_v25  ;;  %v489_v32 = vpop.f32.mrb[3].mxu1 }
 0x1d6   :  { %v1236_v34 = vadd.f32 %v775_v25, %v489_v32 }
 0x1d7   :  { %564 = vmax.xlane.f32.xlu1 %v1232_v31  ;;  %558 = vmax.xlane.f32.xlu0 %v1230_v30 }
 0x1d8   :  { %v896_v33 = vpop.f32.mrb[4].mxu1 }
 0x1d9   :  { %v499_v35 = vpop.f32.mrb[5].mxu1  ;;  %v1242_v38 = vadd.f32 %v896_v33, %v775_v25 }
 0x1da   :  { %v1238_v36 = vadd.f32 %v775_v25, %v499_v35 }
 0x1db   :  { %562 = vmax.xlane.f32.xlu1 %v1236_v34 }
 0x1dc   :  { %v899_v37 = vpop.f32.mrb[6].mxu1  ;;  %566 = vmax.xlane.f32.xlu0 %v1238_v36 }
 0x1dd   :  { %v509_v39 = vpop.f32.mrb[7].mxu1  ;;  %v1248_v42 = vadd.f32 %v899_v37, %v775_v25 }
 0x1de   :  { %v1244_v40 = vadd.f32 %v775_v25, %v509_v39 }
 0x1df   :  { %568 = vmax.xlane.f32.xlu1 %v1242_v38 }
 0x1e0   :  { %570 = vmax.xlane.f32.xlu0 %v1244_v40  ;;  %v902_v41 = vpop.f32.mrb[8].mxu1 }
 0x1e1   :  { %v519_v43 = vpop.f32.mrb[9].mxu1  ;;  %v1254_v46 = vadd.f32 %v902_v41, %v775_v25 }
 0x1e2   :  { %v1250_v44 = vadd.f32 %v775_v25, %v519_v43 }
 0x1e3   :  { %572 = vmax.xlane.f32.xlu1 %v1248_v42 }
 0x1e4   :  { %v905_v45 = vpop.f32.mrb[10].mxu1  ;;  %574 = vmax.xlane.f32.xlu0 %v1250_v44 }
 0x1e5   :  { %v529_v47 = vpop.f32.mrb[11].mxu1  ;;  %v1260_v50 = vadd.f32 %v905_v45, %v775_v25 }
 0x1e6   :  { %v1256_v48 = vadd.f32 %v775_v25, %v529_v47 }
 0x1e7   :  { %576 = vmax.xlane.f32.xlu1 %v1254_v46 }
 0x1e8   :  { %578 = vmax.xlane.f32.xlu0 %v1256_v48  ;;  %v908_v49 = vpop.f32.mrb[12].mxu1 }
 0x1e9   :  { %v539_v51 = vpop.f32.mrb[13].mxu1  ;;  %v1266_v54 = vadd.f32 %v908_v49, %v775_v25 }
 0x1ea   :  { %v1262_v52 = vadd.f32 %v775_v25, %v539_v51 }
 0x1eb   :  { %580 = vmax.xlane.f32.xlu1 %v1260_v50 }
 0x1ec   :  { %v911_v53 = vpop.f32.mrb[14].mxu1  ;;  %582 = vmax.xlane.f32.xlu0 %v1262_v52 }
 0x1ed   :  { %v549_v55 = vpop.f32.mrb[15].mxu1  ;;  %v1272_v57 = vadd.f32 %v911_v53, %v775_v25 }
 0x1ee   :  { %v1268_v56 = vadd.f32 %v775_v25, %v549_v55 }
 0x1ef   :  { %584 = vmax.xlane.f32.xlu1 %v1266_v54 }
 0x1f0   :  { %586 = vmax.xlane.f32.xlu0 %v1268_v56 }
 0x1f3   :  { %588 = vmax.xlane.f32.xlu1 %v1272_v57 }
 0x260   :  { %v1275_v58 = vpop.xlane.xlu0 %560 }
 0x261   :  { %v591_v59 = vsub.f32 %v1227_v27, %v1275_v58 }
 0x263   :  { %v608_v60 = vmul.f32 1.442695, %v591_v59 }
 0x264   :  { %v1279_v61 = vpop.xlane.xlu1 %564  ;;  %v1281_v62 = vpop.xlane.xlu0 %558 }
 0x265   :  { %960 = vpow2.f32 %v608_v60  ;;  %v593_v63 = vsub.f32 %v1232_v31, %v1279_v61  ;;  %v590_v0 = vsub.f32 %v1230_v30, %v1281_v62 }
 0x267   :  { %v612_v1 = vmul.f32 1.442695, %v593_v63  ;;  %v606_v2 = vmul.f32 1.442695, %v590_v0 }
 0x268   :  { %v1287_v3 = vpop.xlane.xlu1 %562 }
 0x269   :  { %962 = vpow2.f32 %v612_v1  ;;  %v592_v4 = vsub.f32 %v1236_v34, %v1287_v3  ;;  %v1291_v5 = vpop.xlane.xlu0 %566 }
 0x26a   :  { %964 = vpow2.f32 %v606_v2  ;;  %v594_v6 = vsub.f32 %v1238_v36, %v1291_v5 }
 0x26b   :  { %v610_v7 = vmul.f32 1.442695, %v592_v4 }
 0x26c   :  { %v1295_v8 = vpop.xlane.xlu1 %568  ;;  %v614_v11 = vmul.f32 1.442695, %v594_v6 }
 0x26d   :  { %966 = vpow2.f32 %v610_v7  ;;  %v595_v9 = vsub.f32 %v1242_v38, %v1295_v8  ;;  %v1299_v10 = vpop.xlane.xlu0 %570 }
 0x26e   :  { %v596_v12 = vsub.f32 %v1244_v40, %v1299_v10 }
 0x26f   :  { %v961_v13 = vpop.eup %960  ;;  %v616_v14 = vmul.f32 1.442695, %v595_v9 }
 0x270   :  { %v1303_v15 = vpop.xlane.xlu1 %572  ;;  %640 = vadd.xlane.f32.xlu1 %v961_v13  ;;  %v618_v18 = vmul.f32 1.442695, %v596_v12 }
 0x271   :  { %968 = vpow2.f32 %v616_v14  ;;  %v597_v16 = vsub.f32 %v1248_v42, %v1303_v15  ;;  %v1307_v17 = vpop.xlane.xlu0 %574 }
 0x272   :  { %970 = vpow2.f32 %v614_v11  ;;  %v598_v19 = vsub.f32 %v1250_v44, %v1307_v17 }
 0x273   :  { %v963_v20 = vpop.eup %962  ;;  %v620_v21 = vmul.f32 1.442695, %v597_v16 }
 0x274   :  { %v965_v22 = vpop.eup %964  ;;  %v1311_v23 = vpop.xlane.xlu1 %576  ;;  %644 = vadd.xlane.f32.xlu1 %v963_v20  ;;  %v622_v26 = vmul.f32 1.442695, %v598_v19 }
 0x275   :  { %972 = vpow2.f32 %v620_v21  ;;  %v599_v24 = vsub.f32 %v1254_v46, %v1311_v23  ;;  %638 = vadd.xlane.f32.xlu0 %v965_v22  ;;  %v1315_v25 = vpop.xlane.xlu0 %578 }
 0x276   :  { %974 = vpow2.f32 %v618_v18  ;;  %v600_v28 = vsub.f32 %v1256_v48, %v1315_v25 }
 0x277   :  { %v967_v29 = vpop.eup %966  ;;  %v624_v32 = vmul.f32 1.442695, %v599_v24 }
 0x278   :  { %v1319_v33 = vpop.xlane.xlu1 %580  ;;  %v626_v39 = vmul.f32 1.442695, %v600_v28 }
 0x279   :  { %976 = vpow2.f32 %v624_v32  ;;  %v601_v35 = vsub.f32 %v1260_v50, %v1319_v33  ;;  %642 = vadd.xlane.f32.xlu0 %v967_v29  ;;  %v1323_v37 = vpop.xlane.xlu0 %582 }
 0x27a   :  { %978 = vpow2.f32 %v622_v26  ;;  %v602_v41 = vsub.f32 %v1262_v52, %v1323_v37 }
 0x27b   :  { %v969_v43 = vpop.eup %968  ;;  %v628_v45 = vmul.f32 1.442695, %v601_v35 }
 0x27c   :  { %v971_v47 = vpop.eup %970  ;;  %v1327_v49 = vpop.xlane.xlu1 %584  ;;  %648 = vadd.xlane.f32.xlu1 %v969_v43  ;;  %v630_v55 = vmul.f32 1.442695, %v602_v41 }
 0x27d   :  { %980 = vpow2.f32 %v628_v45  ;;  %v603_v51 = vsub.f32 %v1266_v54, %v1327_v49  ;;  %646 = vadd.xlane.f32.xlu0 %v971_v47  ;;  %v1331_v53 = vpop.xlane.xlu0 %586 }
 0x27e   :  { %982 = vpow2.f32 %v626_v39  ;;  %v604_v59 = vsub.f32 %v1268_v56, %v1331_v53 }
 0x27f   :  { %v973_v60 = vpop.eup %972  ;;  %v632_v63 = vmul.f32 1.442695, %v603_v51 }
 0x280   :  { %v975_v0 = vpop.eup %974  ;;  %652 = vadd.xlane.f32.xlu1 %v973_v60  ;;  %v1335_v1 = vpop.xlane.xlu1 %588  ;;  %v634_v4 = vmul.f32 1.442695, %v604_v59 }
 0x281   :  { %984 = vpow2.f32 %v632_v63  ;;  %v605_v2 = vsub.f32 %v1272_v57, %v1335_v1  ;;  %650 = vadd.xlane.f32.xlu0 %v975_v0 }
 0x282   :  { %986 = vpow2.f32 %v630_v55 }
 0x283   :  { %v977_v6 = vpop.eup %976  ;;  %v636_v7 = vmul.f32 1.442695, %v605_v2 }
 0x284   :  { %v979_v9 = vpop.eup %978  ;;  %656 = vadd.xlane.f32.xlu1 %v977_v6 }
 0x285   :  { %988 = vpow2.f32 %v636_v7  ;;  %654 = vadd.xlane.f32.xlu0 %v979_v9 }
 0x286   :  { %990 = vpow2.f32 %v634_v4 }
 0x287   :  { %v981_v11 = vpop.eup %980 }
 0x288   :  { %v983_v12 = vpop.eup %982  ;;  %660 = vadd.xlane.f32.xlu1 %v981_v11 }
 0x289   :  { %658 = vadd.xlane.f32.xlu0 %v983_v12 }
 0x28b   :  { %v985_v13 = vpop.eup %984 }
 0x28c   :  { %v987_v14 = vpop.eup %986  ;;  %664 = vadd.xlane.f32.xlu1 %v985_v13 }
 0x28d   :  { %662 = vadd.xlane.f32.xlu0 %v987_v14 }
 0x28f   :  { %v989_v16 = vpop.eup %988 }
 0x290   :  { %v991_v18 = vpop.eup %990  ;;  %668 = vadd.xlane.f32.xlu1 %v989_v16 }
 0x291   :  { %666 = vadd.xlane.f32.xlu0 %v991_v18 }
 0x2fd   :  { %v641_v19 = vpop.xlane.xlu1 %640 }
 0x2fe   :  { %992 = vlog2.f32 %v641_v19 }
 0x301   :  { %v645_v20 = vpop.xlane.xlu1 %644 }
 0x302   :  { %994 = vlog2.f32 %v645_v20  ;;  %v639_v21 = vpop.xlane.xlu0 %638 }
 0x303   :  { %996 = vlog2.f32 %v639_v21 }
 0x306   :  { %v643_v22 = vpop.xlane.xlu0 %642 }
 0x307   :  { %998 = vlog2.f32 %v643_v22 }
 0x308   :  { %v993_v24 = vpop.eup %992 }
 0x309   :  { %v673_v26 = vmul.f32 0.6931472, %v993_v24  ;;  %v649_v28 = vpop.xlane.xlu1 %648 }
 0x30a   :  { %1000 = vlog2.f32 %v649_v28  ;;  %v647_v29 = vpop.xlane.xlu0 %646 }
 0x30b   :  { %v703_v32 = vadd.f32 %v673_v26, %v1275_v58  ;;  %1002 = vlog2.f32 %v647_v29 }
 0x30c   :  { %v995_v35 = vpop.eup %994 }
 0x30d   :  { %v997_v39 = vpop.eup %996  ;;  %v719_v41 = vsub.f32 %v1227_v27, %v703_v32  ;;  %v677_v43 = vmul.f32 0.6931472, %v995_v35  ;;  %v653_v45 = vpop.xlane.xlu1 %652 }
 0x30e   :  { %v671_v47 = vmul.f32 0.6931472, %v997_v39  ;;  %1004 = vlog2.f32 %v653_v45  ;;  %v651_v51 = vpop.xlane.xlu0 %650 }
 0x30f   :  { %735 = vst [vmem:[%s1425_s6 + $0x8] sm:$0xff] %v719_v41  ;;  %v705_v55 = vadd.f32 %v677_v43, %v1279_v61  ;;  %1006 = vlog2.f32 %v651_v51 }
 0x310   :  { %v702_v59 = vadd.f32 %v671_v47, %v1281_v62 }
 0x311   :  { %v999_v58 = vpop.eup %998  ;;  %v721_v60 = vsub.f32 %v1232_v31, %v705_v55  ;;  %v657_v63 = vpop.xlane.xlu1 %656 }
 0x312   :  { %v718_v27 = vsub.f32 %v1230_v30, %v702_v59  ;;  %v675_v0 = vmul.f32 0.6931472, %v999_v58  ;;  %1008 = vlog2.f32 %v657_v63  ;;  %v655_v2 = vpop.xlane.xlu0 %654 }
 0x313   :  { %737 = vst [vmem:[%s1425_s6 + $0x18] sm:$0xff] %v721_v60  ;;  %1010 = vlog2.f32 %v655_v2 }
 0x314   :  { %v1001_v4 = vpop.eup %1000  ;;  %734 = vst [vmem:[%s1425_s6] sm:$0xff] %v718_v27  ;;  %v704_v61 = vadd.f32 %v675_v0, %v1287_v3 }
 0x315   :  { %v1003_v62 = vpop.eup %1002  ;;  %v681_v31 = vmul.f32 0.6931472, %v1001_v4  ;;  %v661_v6 = vpop.xlane.xlu1 %660 }
 0x316   :  { %v720_v30 = vsub.f32 %v1236_v34, %v704_v61  ;;  %v679_v7 = vmul.f32 0.6931472, %v1003_v62  ;;  %1012 = vlog2.f32 %v661_v6  ;;  %v659_v9 = vpop.xlane.xlu0 %658 }
 0x317   :  { %v707_v11 = vadd.f32 %v681_v31, %v1295_v8  ;;  %1014 = vlog2.f32 %v659_v9 }
 0x318   :  { %v1005_v12 = vpop.eup %1004  ;;  %736 = vst [vmem:[%s1425_s6 + $0x10] sm:$0xff] %v720_v30  ;;  %v706_v13 = vadd.f32 %v679_v7, %v1291_v5 }
 0x319   :  { %v1007_v14 = vpop.eup %1006  ;;  %v723_v3 = vsub.f32 %v1242_v38, %v707_v11  ;;  %v685_v16 = vmul.f32 0.6931472, %v1005_v12  ;;  %v665_v18 = vpop.xlane.xlu1 %664 }
 0x31a   :  { %v722_v34 = vsub.f32 %v1238_v36, %v706_v13  ;;  %v683_v19 = vmul.f32 0.6931472, %v1007_v14  ;;  %1016 = vlog2.f32 %v665_v18  ;;  %v663_v20 = vpop.xlane.xlu0 %662 }
 0x31b   :  { %739 = vst [vmem:[%s1425_s6 + $0x28] sm:$0xff] %v723_v3  ;;  %v709_v8 = vadd.f32 %v685_v16, %v1303_v15  ;;  %1018 = vlog2.f32 %v663_v20 }
 0x31c   :  { %v1009_v21 = vpop.eup %1008  ;;  %738 = vst [vmem:[%s1425_s6 + $0x20] sm:$0xff] %v722_v34  ;;  %v708_v38 = vadd.f32 %v683_v19, %v1299_v10 }
 0x31d   :  { %v1011_v5 = vpop.eup %1010  ;;  %v725_v36 = vsub.f32 %v1248_v42, %v709_v8  ;;  %v689_v22 = vmul.f32 0.6931472, %v1009_v21  ;;  %v669_v24 = vpop.xlane.xlu1 %668 }
 0x31e   :  { %v724_v26 = vsub.f32 %v1244_v40, %v708_v38  ;;  %v687_v28 = vmul.f32 0.6931472, %v1011_v5  ;;  %1020 = vlog2.f32 %v669_v24  ;;  %v667_v29 = vpop.xlane.xlu0 %666 }
 0x31f   :  { %741 = vst [vmem:[%s1425_s6 + $0x38] sm:$0xff] %v725_v36  ;;  %v711_v15 = vadd.f32 %v689_v22, %v1311_v23  ;;  %1022 = vlog2.f32 %v667_v29 }
 0x320   :  { %v1013_v32 = vpop.eup %1012  ;;  %740 = vst [vmem:[%s1425_s6 + $0x30] sm:$0xff] %v724_v26  ;;  %v710_v42 = vadd.f32 %v687_v28, %v1307_v17 }
 0x321   :  { %v1015_v10 = vpop.eup %1014  ;;  %v727_v40 = vsub.f32 %v1254_v46, %v711_v15  ;;  %v693_v35 = vmul.f32 0.6931472, %v1013_v32 }
 0x322   :  { %v726_v39 = vsub.f32 %v1250_v44, %v710_v42  ;;  %v691_v41 = vmul.f32 0.6931472, %v1015_v10 }
 0x323   :  { %743 = vst [vmem:[%s1425_s6 + $0x48] sm:$0xff] %v727_v40  ;;  %v713_v23 = vadd.f32 %v693_v35, %v1319_v33 }
 0x324   :  { %v1017_v43 = vpop.eup %1016  ;;  %742 = vst [vmem:[%s1425_s6 + $0x40] sm:$0xff] %v726_v39  ;;  %v712_v17 = vadd.f32 %v691_v41, %v1315_v25 }
 0x325   :  { %v1019_v45 = vpop.eup %1018  ;;  %v729_v46 = vsub.f32 %v1260_v50, %v713_v23  ;;  %v697_v47 = vmul.f32 0.6931472, %v1017_v43 }
 0x326   :  { %v728_v44 = vsub.f32 %v1256_v48, %v712_v17  ;;  %v695_v51 = vmul.f32 0.6931472, %v1019_v45 }
 0x327   :  { %745 = vst [vmem:[%s1425_s6 + $0x58] sm:$0xff] %v729_v46  ;;  %v715_v33 = vadd.f32 %v697_v47, %v1327_v49 }
 0x328   :  { %v1021_v55 = vpop.eup %1020  ;;  %744 = vst [vmem:[%s1425_s6 + $0x50] sm:$0xff] %v728_v44  ;;  %v714_v25 = vadd.f32 %v695_v51, %v1323_v37 }
 0x329   :  { %v1023_v59 = vpop.eup %1022  ;;  %v731_v50 = vsub.f32 %v1266_v54, %v715_v33  ;;  %v701_v58 = vmul.f32 0.6931472, %v1021_v55 }
 0x32a   :  { %v730_v48 = vsub.f32 %v1262_v52, %v714_v25  ;;  %v699_v60 = vmul.f32 0.6931472, %v1023_v59 }
 0x32b   :  { %747 = vst [vmem:[%s1425_s6 + $0x68] sm:$0xff] %v731_v50  ;;  %v717_v49 = vadd.f32 %v701_v58, %v1335_v1 }
 0x32c   :  { %746 = vst [vmem:[%s1425_s6 + $0x60] sm:$0xff] %v730_v48  ;;  %v716_v63 = vadd.f32 %v699_v60, %v1331_v53 }
 0x32d   :  { %v733_v37 = vsub.f32 %v1272_v57, %v717_v49 }
 0x32e   :  { %v732_v54 = vsub.f32 %v1268_v56, %v716_v63 }
 0x32f   :  { %749 = vst [vmem:[%s1425_s6 + $0x78] sm:$0xff] %v733_v37 }
 0x330   :  { %748 = vst [vmem:[%s1425_s6 + $0x70] sm:$0xff] %v732_v54 }

</bundles_post_ra>
